<compile_context>
chip_gen: v6e
topology: v6e:2x2x1
jax: 0.10.0
libtpu: 0.0.40
codegen_flags: <defaults>
</compile_context>

<pallas_src>
import jax
import jax.numpy as jnp
from jax import lax
from jax.experimental import pallas as pl
from jax.experimental.pallas import tpu as pltpu

_RESIDENT_WEIGHT_BUDGET = 8 * 1024 * 1024   # keep all layers VMEM-resident below this
_VMEM_LIMIT = 32 * 1024 * 1024              # safe on v5e / v6e / v7x


def _round_up(v, m):
    return ((v + m - 1) // m) * m


def _relu_matmul(h, w):
    """relu(h @ w) with bf16 MXU operands and f32 accumulation."""
    y = lax.dot_general(
        h.astype(jnp.bfloat16),
        w.astype(jnp.bfloat16),
        dimension_numbers=(((1,), (0,)), ((), ())),
        preferred_element_type=jnp.float32,
    )
    return jnp.maximum(y, 0.0)


# ---- Path A: all layers' weights resident in VMEM, layer loop inside the kernel ----
def foonet_resident_kernel(x_ref, w_ref, o_ref):
    """One batch tile: o = relu(...relu(x @ W0)... @ W_{L-1}); w_ref is (L, Np, Np)."""
    n_layers = w_ref.shape[0]
    h = x_ref[...].astype(jnp.float32)
    if n_layers <= 8:
        for l in range(n_layers):                       # small static stack: unroll
            h = _relu_matmul(h, w_ref[l])
    else:
        h = lax.fori_loop(0, n_layers,
                          lambda l, h: _relu_matmul(h, w_ref[l]), h)
    o_ref[...] = h.astype(o_ref.dtype)


# ---- Path B: layer-streamed weights (one (Np, Np) layer per grid step) ----
def foonet_streamed_kernel(x_ref, w_ref, o_ref):
    """One (batch-tile, layer) step: o = relu(h @ W[l]).

    o_ref's block index is constant across the innermost 'arbitrary' layer axis,
    so it stays VMEM-resident and doubles as the activation buffer (written back
    to HBM only after the last layer).  NOTE: relies on the layer axis staying
    innermost in the grid.
    """
    l = pl.program_id(1)

    @pl.when(l == 0)
    def _():
        o_ref[...] = _relu_matmul(x_ref[...], w_ref[...]).astype(o_ref.dtype)

    @pl.when(l != 0)
    def _():
        o_ref[...] = _relu_matmul(o_ref[...], w_ref[...]).astype(o_ref.dtype)


def prepare_foonet_weights(weights, dtype=jnp.bfloat16):
    """One-time (init) weight prep, hoisted out of the per-call path.

    (L, N_out, N_in) nn.Linear layout -> (L, Np_in, Np_out), zero-padded to
    lane-dense multiples of 128, transposed (so the kernel contracts ((1,),(0,))
    with no in-kernel transpose), and cast to bf16 for the MXU.
    """
    L, n_out, n_in = weights.shape
    np_in = _round_up(n_in, 128)
    np_out = _round_up(n_out, 128)
    wt = jnp.swapaxes(weights, 1, 2).astype(dtype)      # (L, in, out)
    return jnp.zeros((L, np_in, np_out), dtype).at[:, :n_in, :n_out].set(wt)


def _pick_batch_tile(B):
    # >=2 tiles for large batches (v7x megacore) and multiples of 256 where
    # possible (v6e/v7x 256x256 MXU); small batches become a single 8-aligned tile.
    if B >= 1024:
        return 512
    if B >= 512:
        return 256
    if B >= 256:
        return 128
    return _round_up(B, 8)


def foonet_forward(x, w_prepped, *, force_streamed=False):
    """x: (B, N) f32; w_prepped: (L, Np, Np) bf16 from prepare_foonet_weights."""
    B, N = x.shape
    L, np_in, np_out = w_prepped.shape
    assert np_in == np_out and np_in % 128 == 0 and np_in >= N
    Np = np_in

    TB = _pick_batch_tile(B)
    Bp = _round_up(B, TB)
    num_bt = Bp // TB

    # Zero-pad the input; padded lanes/rows stay exactly 0 through relu(h @ W).
    if (Bp, Np) != (B, N):
        xp = jnp.zeros((Bp, Np), x.dtype).at[:B, :N].set(x)
    else:
        xp = x

    x_bytes = jnp.dtype(x.dtype).itemsize
    w_bytes_total = L * Np * Np * jnp.dtype(w_prepped.dtype).itemsize
    flops = 2 * Bp * Np * Np * L

    resident = (not force_streamed) and w_bytes_total <= _RESIDENT_WEIGHT_BUDGET

    if resident:
        out = pl.pallas_call(
            foonet_resident_kernel,
            out_shape=jax.ShapeDtypeStruct((Bp, Np), x.dtype),
            grid=(num_bt,),
            in_specs=[
                pl.BlockSpec((TB, Np), lambda b: (b, 0)),        # activation tile
                pl.BlockSpec((L, Np, Np), lambda b: (0, 0, 0)),  # all layers, fetched once
            ],
            out_specs=pl.BlockSpec((TB, Np), lambda b: (b, 0)),
            compiler_params=pltpu.CompilerParams(
                dimension_semantics=("parallel",),
                vmem_limit_bytes=_VMEM_LIMIT,
            ),
            cost_estimate=pl.CostEstimate(
                flops=flops,
                transcendentals=0,
                bytes_accessed=2 * Bp * Np * x_bytes + w_bytes_total,
            ),
        )(xp, w_prepped)
    else:
        out = pl.pallas_call(
            foonet_streamed_kernel,
            out_shape=jax.ShapeDtypeStruct((Bp, Np), x.dtype),
            grid=(num_bt, L),                                    # layer axis innermost
            in_specs=[
                pl.BlockSpec((TB, Np), lambda b, l: (b, 0)),
                pl.BlockSpec((pl.Squeezed(), Np, Np), lambda b, l: (l, 0, 0)),
            ],
            out_specs=pl.BlockSpec((TB, Np), lambda b, l: (b, 0)),
            compiler_params=pltpu.CompilerParams(
                dimension_semantics=("parallel", "arbitrary"),
                vmem_limit_bytes=_VMEM_LIMIT,
            ),
            cost_estimate=pl.CostEstimate(
                flops=flops,
                transcendentals=0,
                bytes_accessed=2 * Bp * Np * x_bytes + num_bt * w_bytes_total,
            ),
        )(xp, w_prepped)

    return out[:B, :N]


def foonet_reference(x, weights):
    h = x
    for i in range(weights.shape[0]):
        h = jnp.maximum(h @ weights[i].T, 0.0)
    return h


if __name__ == "__main__":
    # Small shapes consistent with FooNet(neural_num=32, layers=3), batch=8.
    # NOTE: the PyTorch forward's `print(batch size)` is host-side logging only
    # and is intentionally not reproduced on-device.
    B, N, L = 8, 32, 3
    key = jax.random.PRNGKey(0)
    kx, kw = jax.random.split(key)

    x = jax.random.normal(kx, (B, N), dtype=jnp.float32)
    weights = jax.random.normal(kw, (L, N, N), dtype=jnp.float32) / jnp.sqrt(N)

    # One-time weight prep (pad + transpose + bf16), hoisted out of the forward.
    w_prepped = prepare_foonet_weights(weights)

    ref = foonet_reference(x, weights)

    # Default path: all layers' weights resident in VMEM, fused layer loop.
    out = jax.block_until_ready(foonet_forward(x, w_prepped))
    assert out.shape == (B, N)
    assert jnp.allclose(out, ref, atol=5e-2, rtol=5e-2), float(
        jnp.max(jnp.abs(out - ref)))

    # Also exercise the layer-streamed fallback (used when the weight stack does
    # not fit the VMEM budget).
    out_s = jax.block_until_ready(foonet_forward(x, w_prepped, force_streamed=True))
    assert jnp.allclose(out_s, ref, atol=5e-2, rtol=5e-2), float(
        jnp.max(jnp.abs(out_s - ref)))

    print("KERNEL_OK")
</pallas_src>

<mosaic_0001>
module attributes {stable_mosaic.version = 11 : i64} {
  func.func @foonet_resident_kernel(%arg0: i32, %arg1: memref<8x128xf32, #tpu.memory_space<vmem>>, %arg2: memref<3x128x128xbf16, #tpu.memory_space<vmem>>, %arg3: memref<8x128xf32, #tpu.memory_space<vmem>>) attributes {dimension_semantics = [#tpu.dimension_semantics<parallel>], iteration_bounds = array<i64: 1>, scalar_prefetch = 0 : i64, scratch_operands = 0 : i64, tpu.core_type = #tpu.core_type<tc>, window_params = [{transform_indices = @transform_0, window_bounds = array<i64: 8, 128>}, {pipeline_mode = #tpu.pipeline_mode<synchronous>, transform_indices = @transform_1, window_bounds = array<i64: 3, 128, 128>}, {transform_indices = @transform_2, window_bounds = array<i64: 8, 128>}]} {
    %c0 = arith.constant 0 : index
    %c0_0 = arith.constant 0 : index
    %0 = vector.load %arg1[%c0, %c0_0] : memref<8x128xf32, #tpu.memory_space<vmem>>, vector<8x128xf32>
    %c0_1 = arith.constant 0 : index
    %c0_2 = arith.constant 0 : index
    %c0_3 = arith.constant 0 : index
    %1 = vector.load %arg2[%c0_1, %c0_2, %c0_3] : memref<3x128x128xbf16, #tpu.memory_space<vmem>>, vector<1x128x128xbf16>
    %2 = vector.shape_cast %1 : vector<1x128x128xbf16> to vector<128x128xbf16>
    %3 = arith.truncf %0 : vector<8x128xf32> to vector<8x128xbf16>
    %cst = arith.constant dense<0.000000e+00> : vector<8x128xf32>
    %4 = tpu.matmul %3, %2, %cst {dimension_numbers = #tpu.dot_dimension_numbers<[1], [0], [0], [1], [0, 0, 1, 1], [], []>} : vector<8x128xbf16>, vector<128x128xbf16>, vector<8x128xf32> -> vector<8x128xf32>
    %cst_4 = arith.constant 0.000000e+00 : f32
    %5 = vector.broadcast %cst_4 : f32 to vector<8x128xf32>
    %6 = arith.maximumf %4, %5 : vector<8x128xf32>
    %c1 = arith.constant 1 : index
    %c0_5 = arith.constant 0 : index
    %c0_6 = arith.constant 0 : index
    %7 = vector.load %arg2[%c1, %c0_5, %c0_6] : memref<3x128x128xbf16, #tpu.memory_space<vmem>>, vector<1x128x128xbf16>
    %8 = vector.shape_cast %7 : vector<1x128x128xbf16> to vector<128x128xbf16>
    %9 = arith.truncf %6 : vector<8x128xf32> to vector<8x128xbf16>
    %cst_7 = arith.constant dense<0.000000e+00> : vector<8x128xf32>
    %10 = tpu.matmul %9, %8, %cst_7 {dimension_numbers = #tpu.dot_dimension_numbers<[1], [0], [0], [1], [0, 0, 1, 1], [], []>} : vector<8x128xbf16>, vector<128x128xbf16>, vector<8x128xf32> -> vector<8x128xf32>
    %cst_8 = arith.constant 0.000000e+00 : f32
    %11 = vector.broadcast %cst_8 : f32 to vector<8x128xf32>
    %12 = arith.maximumf %10, %11 : vector<8x128xf32>
    %c2 = arith.constant 2 : index
    %c0_9 = arith.constant 0 : index
    %c0_10 = arith.constant 0 : index
    %13 = vector.load %arg2[%c2, %c0_9, %c0_10] : memref<3x128x128xbf16, #tpu.memory_space<vmem>>, vector<1x128x128xbf16>
    %14 = vector.shape_cast %13 : vector<1x128x128xbf16> to vector<128x128xbf16>
    %15 = arith.truncf %12 : vector<8x128xf32> to vector<8x128xbf16>
    %cst_11 = arith.constant dense<0.000000e+00> : vector<8x128xf32>
    %16 = tpu.matmul %15, %14, %cst_11 {dimension_numbers = #tpu.dot_dimension_numbers<[1], [0], [0], [1], [0, 0, 1, 1], [], []>} : vector<8x128xbf16>, vector<128x128xbf16>, vector<8x128xf32> -> vector<8x128xf32>
    %cst_12 = arith.constant 0.000000e+00 : f32
    %17 = vector.broadcast %cst_12 : f32 to vector<8x128xf32>
    %18 = arith.maximumf %16, %17 : vector<8x128xf32>
    %c0_13 = arith.constant 0 : index
    %c0_14 = arith.constant 0 : index
    %19 = vector.load %arg3[%c0_13, %c0_14] : memref<8x128xf32, #tpu.memory_space<vmem>>, vector<8x128xf32>
    tpu.vector_store %arg3[%c0_13, %c0_14], %18 {strides = array<i32>} : memref<8x128xf32, #tpu.memory_space<vmem>>, vector<8x128xf32>,
    return
  }
  func.func @transform_0(%arg0: i32) -> (i32, i32) {
    %c0_i32 = arith.constant 0 : i32
    %c0_i32_0 = arith.constant 0 : i32
    return %arg0, %c0_i32 : i32, i32
  }
  func.func @transform_1(%arg0: i32) -> (i32, i32, i32) {
    %c0_i32 = arith.constant 0 : i32
    %c0_i32_0 = arith.constant 0 : i32
    %c0_i32_1 = arith.constant 0 : i32
    %c0_i32_2 = arith.constant 0 : i32
    return %c0_i32, %c0_i32_0, %c0_i32_1 : i32, i32, i32
  }
  func.func @transform_2(%arg0: i32) -> (i32, i32) {
    %c0_i32 = arith.constant 0 : i32
    %c0_i32_0 = arith.constant 0 : i32
    return %arg0, %c0_i32 : i32, i32
  }
}

</mosaic_0001>

<bundles_post_ra>
// kernel: tpu_custom_call.1
= control target key start
LH: loop header
LB: loop body
LE: loop exit
PB: predicated region body
PF: predicated region fallthrough
CT: control target
= control target key end

     0   :  { %7 = vsyncpa [#allocation3], 0  ;;  %s646_s0 = inlined_call_operand.hbm [shape: f32[8,128], index: 0, kind: input, shape index: {}]   ;;  %s647_s1 = inlined_call_operand.hbm [shape: bf16[3,128,128], index: 1, kind: input, shape index: {}]   ;;  %s648_s2 = inlined_call_operand.hbm [shape: f32[8,128], index: 2, kind: output, shape index: {}]  }
   0x1   :  { %8 = vsyncpa [#allocation6], 0 }
   0x2   :  { %9 = vsyncpa [#allocation4], 0  ;;  %s585_s9 = smov [#allocation2]   ;;  %s586_s11 = smov [#allocation5]  }
   0x3   :  { %s16_s10 = sshll.u32 %s585_s9, 4  ;;  %s25_s12 = sshll.u32 %s586_s11, 4  ;;  %s17_s10 = int_to_ptr.vmem [resolvable:$true] %s16_s10  ;;  %s26_s12 = int_to_ptr.vmem [resolvable:$true] %s25_s12 }
   0x4   :  { %s527_s13 = scalar_lea.vmem %s17_s10, 128  ;;  %p532_p1 = scmp.lt.s32.totalorder %s17_s10, %s17_s10 }
   0x5   :  { %p528_p0 = scmp.ne.s32.totalorder %s17_s10, %s527_s13  ;;  %p533_p2 = scmp.lt.s32.totalorder %s527_s13, %s527_s13 }
   0x7   :  { %p534_p3 = por %p533_p2, %p532_p1 }
   0x9   :  { %p535_p4 = pnand %p534_p3, %p528_p0 }
   0xb   :  { %538 = shalt.err (!%p535_p4)
}
   0xc   :  { %19 = dma.hbm_to_vmem [thread:$0]  %s646_s0, 128, %s17_s10, [#allocation3]  }
   0xd   :  { %s547_s16 = scalar_lea.vmem %s26_s12, 3072  ;;  %p552_p6 = scmp.lt.s32.totalorder %s26_s12, %s26_s12 }
   0xe   :  { %p548_p5 = scmp.ne.s32.totalorder %s26_s12, %s547_s16  ;;  %p553_p7 = scmp.lt.s32.totalorder %s547_s16, %s547_s16 }
  0x10   :  { %p554_p8 = por %p553_p7, %p552_p6 }
  0x12   :  { %p555_p9 = pnand %p554_p8, %p548_p5 }
  0x14   :  { %558 = shalt.err (!%p555_p9)
}
  0x15   :  { %s587_s17 = smov 64   ;;  %s588_s18 = smov 4  }
  0x16   :  { %31 = dma.hbm_to_vmem [thread:$0]  %s647_s1, 3072, %s26_s12, [#allocation6], %s587_s17, %s587_s17, %s588_s18  }
  0x17   :  { %579 = dma.done.wait [#allocation3], 128  }
  0x18   :  { %580 = vsyncadd [#allocation3], 4294967168 }
  0x19   :  { %581 = dma.done.wait [#allocation6], 3072  }
  0x1a   :  { %582 = vsyncadd [#allocation6], 4294964224  ;;  %v589_v0 = vmov 0.0   ;;  %vm590_vm0 = vmmov 0   ;;  %v495_v1 = vld [vmem:[#allocation5 + $0x38] sm:$0xff]   ;;  %v496_v2 = vld [vmem:[#allocation5 + $0x30] sm:$0xff]  }
  0x1b   :  { %428 = vmatprep.subr.bf16.mxu0 %v589_v0  ;;  %444 = vmatprep.mubr.msk.bf16.mxu0 %vm590_vm0, %v589_v0  ;;  %v497_v3 = vld [vmem:[#allocation5 + $0x28] sm:$0xff]   ;;  %v503_v4 = vld [vmem:[#allocation5 + $0x78] sm:$0xff]   ;;  %v498_v5 = vld [vmem:[#allocation5 + $0x20] sm:$0xff]   ;;  %s591_s0 = smov [#allocation7]  }
  0x1c   :  { %448 = vmatprep.subr.bf16.mxu1 %v589_v0  ;;  %464 = vmatprep.mubr.msk.bf16.mxu1 %vm590_vm0, %v589_v0  ;;  %v504_v6 = vld [vmem:[#allocation5 + $0x70] sm:$0xff]   ;;  %v499_v7 = vld [vmem:[#allocation5 + $0x18] sm:$0xff]   ;;  %v505_v8 = vld [vmem:[#allocation5 + $0x68] sm:$0xff]   ;;  %s367_s1 = sshll.u32 %s591_s0, 4  ;;  %s368_s1 = int_to_ptr.vmem [resolvable:$true] %s367_s1 }
  0x1d   :  { %429 = vmatpush3.bf16.msra.mxu0 %v495_v1  ;;  %449 = vmatpush3.bf16.msra.mxu1 %v503_v4  ;;  %v500_v9 = vld [vmem:[#allocation5 + $0x10] sm:$0xff]   ;;  %v506_v10 = vld [vmem:[#allocation5 + $0x60] sm:$0xff]   ;;  %v501_v11 = vld [vmem:[#allocation5 + $0x8] sm:$0xff]   ;;  %s559_s21 = scalar_lea.vmem %s368_s1, 128  ;;  %p564_p11 = scmp.lt.s32.totalorder %s368_s1, %s368_s1 }
  0x1e   :  { %430 = vmatprep.subr.bf16.mxu0 %v589_v0  ;;  %450 = vmatprep.subr.bf16.mxu1 %v589_v0  ;;  %v507_v12 = vld [vmem:[#allocation5 + $0x58] sm:$0xff]   ;;  %v502_v13 = vld [vmem:[#allocation5] sm:$0xff]   ;;  %v508_v15 = vld [vmem:[#allocation5 + $0x50] sm:$0xff]   ;;  %p560_p10 = scmp.ne.s32.totalorder %s368_s1, %s559_s21  ;;  %p565_p12 = scmp.lt.s32.totalorder %s559_s21, %s559_s21 }
  0x1f   :  { %v39_v14 = vld [vmem:[#allocation2] sm:$0xff]  ;;  %v509_v17 = vld [vmem:[#allocation5 + $0x48] sm:$0xff]   ;;  %v510_v18 = vld [vmem:[#allocation5 + $0x40] sm:$0xff]  }
  0x20   :  { %v56_v16 = vpack.c.bf16 %v39_v14, %v39_v14  ;;  %v511_v19 = vld [vmem:[#allocation5 + $0xb8] sm:$0xff]   ;;  %v512_v20 = vld [vmem:[#allocation5 + $0xb0] sm:$0xff]   ;;  %v513_v21 = vld [vmem:[#allocation5 + $0xa8] sm:$0xff]   ;;  %p566_p13 = por %p565_p12, %p564_p11 }
  0x21   :  { %431 = vmatpush3.bf16.msra.mxu0 %v496_v2  ;;  %451 = vmatpush3.bf16.msra.mxu1 %v504_v6  ;;  %v514_v22 = vld [vmem:[#allocation5 + $0xa0] sm:$0xff]   ;;  %v515_v23 = vld [vmem:[#allocation5 + $0x98] sm:$0xff]   ;;  %v516_v24 = vld [vmem:[#allocation5 + $0x90] sm:$0xff]  }
  0x22   :  { %432 = vmatprep.subr.bf16.mxu0 %v589_v0  ;;  %452 = vmatprep.subr.bf16.mxu1 %v589_v0  ;;  %v517_v25 = vld [vmem:[#allocation5 + $0x88] sm:$0xff]   ;;  %v518_v32 = vld [vmem:[#allocation5 + $0x80] sm:$0xff]   ;;  %p567_p0 = pnand %p566_p13, %p560_p10 }
  0x25   :  { %433 = vmatpush3.bf16.msra.mxu0 %v497_v3  ;;  %453 = vmatpush3.bf16.msra.mxu1 %v505_v8 }
  0x26   :  { %434 = vmatprep.subr.bf16.mxu0 %v589_v0  ;;  %454 = vmatprep.subr.bf16.mxu1 %v589_v0 }
  0x29   :  { %435 = vmatpush3.bf16.msra.mxu0 %v498_v5  ;;  %455 = vmatpush3.bf16.msra.mxu1 %v506_v10 }
  0x2a   :  { %436 = vmatprep.subr.bf16.mxu0 %v589_v0  ;;  %456 = vmatprep.subr.bf16.mxu1 %v589_v0 }
  0x2d   :  { %437 = vmatpush3.bf16.msra.mxu0 %v499_v7  ;;  %457 = vmatpush3.bf16.msra.mxu1 %v507_v12 }
  0x2e   :  { %438 = vmatprep.subr.bf16.mxu0 %v589_v0  ;;  %458 = vmatprep.subr.bf16.mxu1 %v589_v0 }
  0x31   :  { %439 = vmatpush3.bf16.msra.mxu0 %v500_v9  ;;  %459 = vmatpush3.bf16.msra.mxu1 %v508_v15 }
  0x32   :  { %440 = vmatprep.subr.bf16.mxu0 %v589_v0  ;;  %460 = vmatprep.subr.bf16.mxu1 %v589_v0 }
  0x35   :  { %441 = vmatpush3.bf16.msra.mxu0 %v501_v11  ;;  %461 = vmatpush3.bf16.msra.mxu1 %v509_v17 }
  0x36   :  { %442 = vmatprep.subr.bf16.mxu0 %v589_v0  ;;  %462 = vmatprep.subr.bf16.mxu1 %v589_v0 }
  0x39   :  { %443 = vmatpush3.bf16.msra.mxu0 %v502_v13  ;;  %463 = vmatpush3.bf16.msra.mxu1 %v510_v18 }
  0x3a   :  { %468 = vmatprep.subr.bf16.mxu0 %v589_v0 }
  0x3c   :  { %445 = vmatmul.mubr.bf16.vlgmr.msra.gmra.mxu0 %v56_v16 }
  0x3d   :  { %484 = vmatprep.mubr.msk.bf16.mxu0 %vm590_vm0, %v589_v0  ;;  %469 = vmatpush3.bf16.msra.mxu0 %v511_v19 }
  0x3e   :  { %470 = vmatprep.subr.bf16.mxu0 %v589_v0 }
  0x41   :  { %471 = vmatpush3.bf16.msra.mxu0 %v512_v20 }
  0x42   :  { %472 = vmatprep.subr.bf16.mxu0 %v589_v0 }
  0x45   :  { %473 = vmatpush3.bf16.msra.mxu0 %v513_v21 }
  0x46   :  { %474 = vmatprep.subr.bf16.mxu0 %v589_v0 }
  0x49   :  { %475 = vmatpush3.bf16.msra.mxu0 %v514_v22 }
  0x4a   :  { %476 = vmatprep.subr.bf16.mxu0 %v589_v0 }
  0x4d   :  { %477 = vmatpush3.bf16.msra.mxu0 %v515_v23 }
  0x4e   :  { %478 = vmatprep.subr.bf16.mxu0 %v589_v0 }
  0x51   :  { %479 = vmatpush3.bf16.msra.mxu0 %v516_v24 }
  0x52   :  { %480 = vmatprep.subr.bf16.mxu0 %v589_v0 }
  0x55   :  { %481 = vmatpush3.bf16.msra.mxu0 %v517_v25 }
  0x56   :  { %482 = vmatprep.subr.bf16.mxu0 %v589_v0 }
  0x59   :  { %483 = vmatpush3.bf16.msra.mxu0 %v518_v32 }
  0xfc   :  { %v139_v26 = vpop.f32.mrf.mxu0 }
  0xfd   :  { %v145_v27 = vmax.f32 %v139_v26, 0.0 }
  0xfe   :  { %v446_v28 = vpop.f32.mrf.mxu0 }
  0xff   :  { %v163_v29 = vpack.c.bf16 %v145_v27, %v145_v27 }
 0x100   :  { %v142_v30 = vpop.f32.mrf.mxu0 }
 0x101   :  { %465 = vmatmul.mubr.bf16.vlgmr.msra.gmra.mxu1 %v163_v29 }
 0x102   :  { %v447_v31 = vpop.f32.mrf.mxu0 }
 0x1c1   :  { %v246_v33 = vpop.f32.mrf.mxu1 }
 0x1c2   :  { %v252_v34 = vmax.f32 %v246_v33, 0.0 }
 0x1c3   :  { %v466_v35 = vpop.f32.mrf.mxu1 }
 0x1c4   :  { %v270_v36 = vpack.c.bf16 %v252_v34, %v252_v34 }
 0x1c5   :  { %v249_v37 = vpop.f32.mrf.mxu1 }
 0x1c6   :  { %485 = vmatmul.mubr.bf16.vlgmr.msra.gmra.mxu0 %v270_v36 }
 0x1c7   :  { %v467_v38 = vpop.f32.mrf.mxu1 }
 0x286   :  { %v353_v39 = vpop.f32.mrf.mxu0 }
 0x287   :  { %v359_v40 = vmax.f32 %v353_v39, 0.0 }
 0x288   :  { %v486_v41 = vpop.f32.mrf.mxu0 }
 0x289   :  { %360 = vst [vmem:[#allocation7] sm:$0xff] %v359_v40 }
 0x28a   :  { %v356_v42 = vpop.f32.mrf.mxu0 }
 0x28b   :  { %570 = shalt.err (!%p567_p0)
}
 0x28c   :  { %370 = dma.vmem_to_hbm [thread:$0]  %s368_s1, 128, %s648_s2, [#allocation4]   ;;  %v487_v43 = vpop.f32.mrf.mxu0 }
 0x28d   :  { %583 = dma.done.wait [#allocation4], 128  }
 0x28e   :  { %584 = vsyncadd [#allocation4], 4294967168 }
 0x28f   :  { %374 = vsyncpa [#allocation3], 1 }
 0x290   :  { %375 = vsyncpa [#allocation6], 1 }
 0x291   :  { %376 = vsyncpa [#allocation4], 1 }

</bundles_post_ra>
